<compile_context>
chip_gen: v7x
topology: tpu7x:2x2x1
jax: 0.10.0
libtpu: 0.0.40
codegen_flags: <defaults>
</compile_context>

<pallas_src>
import jax
import jax.numpy as jnp
from jax.experimental import pallas as pl
from jax.experimental.pallas import tpu as pltpu


def mlp_kernel(x_ref, w_ref, b2_ref, o_ref):
    """[1, H, 1] MLP on one lane-dense batch tile.

    x_ref : (1, TN)  VMEM  -- batch on the lane axis
    w_ref : (H, 3)   VMEM  -- packed [w1 | b1 | w2] columns (single DMA)
    b2_ref: (1, 1)   SMEM  -- scalar output bias
    o_ref : (1, TN)  VMEM
    """
    x = x_ref[...]                       # (1, TN)
    w1 = w_ref[:, 0:1]                   # (H, 1) static column slices
    b1 = w_ref[:, 1:2]                   # (H, 1)
    w2 = w_ref[:, 2:3]                   # (H, 1)

    # Layer 1 (d_in = 1): broadcast outer product on the VPU.
    h = w1 * x + b1                      # (H, TN)

    # sigmoid(h) = 0.5 * tanh(0.5 * h) + 0.5  -- one EUP push per vreg, exact.
    h = 0.5 * jnp.tanh(0.5 * h) + 0.5

    # Layer 2 (d_out = 1): weighted sublane reduction (XLU) + scalar bias.
    y = jnp.sum(w2 * h, axis=0, keepdims=True) + b2_ref[0, 0]
    o_ref[...] = y.astype(o_ref.dtype)   # (1, TN) lane-dense store


def net_forward(x, w1, b1, w2, b2, *, lane_tile=32768):
    """Forward pass of Net(layers=[1, H, 1], activation=sigmoid).

    x: (n, 1)   w1: (1, H)   b1: (1, H)/(H,)   w2: (H, 1)   b2: (1, 1)/(1,)
    Returns (n, 1), matching PyTorch's nn.Linear convention.
    """
    n, d_in = x.shape
    d_hidden = w1.shape[1]
    d_out = w2.shape[1]
    assert d_in == 1 and d_out == 1, "kernel is specialized to layers=[1, H, 1]"

    # Pack the three tiny parameter tensors into ONE VMEM block -> one DMA.
    w_packed = jnp.concatenate(
        [w1.reshape(d_hidden, 1),
         b1.reshape(d_hidden, 1),
         w2.reshape(d_hidden, 1)], axis=1)                # (H, 3)
    b2_s = jnp.asarray(b2, x.dtype).reshape(1, 1)         # SMEM scalar

    x_t = x.T                                             # (1, n): batch -> lanes

    if n <= lane_tile:
        # Small batch: single invocation, no grid machinery.
        n_pad = pl.cdiv(n, 128) * 128                     # keep stores lane-dense
        if n_pad != n:
            x_t = jnp.pad(x_t, ((0, 0), (0, n_pad - n)))
        y_t = pl.pallas_call(
            mlp_kernel,
            out_shape=jax.ShapeDtypeStruct((1, n_pad), x.dtype),
            in_specs=[
                pl.BlockSpec(memory_space=pltpu.MemorySpace.VMEM),   # x
                pl.BlockSpec(memory_space=pltpu.MemorySpace.VMEM),   # packed weights
                pl.BlockSpec(memory_space=pltpu.MemorySpace.SMEM),   # b2 scalar
            ],
            out_specs=pl.BlockSpec(memory_space=pltpu.MemorySpace.VMEM),
        )(x_t, w_packed, b2_s)
    else:
        # Large batch: tile the lane axis.  "parallel" lets v7x's two
        # TensorCores split the batch; per-step footprint (~80*TN bytes for
        # the (H, TN) intermediate) stays inside v5e's 16 MiB scoped VMEM.
        num_tiles = pl.cdiv(n, lane_tile)
        n_pad = num_tiles * lane_tile
        if n_pad != n:
            x_t = jnp.pad(x_t, ((0, 0), (0, n_pad - n)))
        y_t = pl.pallas_call(
            mlp_kernel,
            out_shape=jax.ShapeDtypeStruct((1, n_pad), x.dtype),
            grid=(num_tiles,),
            in_specs=[
                pl.BlockSpec((1, lane_tile), lambda i: (0, i)),       # x tile
                pl.BlockSpec((d_hidden, 3), lambda i: (0, 0)),        # packed weights
                pl.BlockSpec(memory_space=pltpu.MemorySpace.SMEM),    # b2 scalar
            ],
            out_specs=pl.BlockSpec((1, lane_tile), lambda i: (0, i)),
            compiler_params=pltpu.CompilerParams(
                dimension_semantics=("parallel",)),
        )(x_t, w_packed, b2_s)

    return y_t[:, :n].T                                    # (n, 1)


def reference_forward(x, w1, b1, w2, b2):
    h = jax.nn.sigmoid(x @ w1 + b1)
    return h @ w2 + b2


if __name__ == "__main__":
    # Shapes implied by the module defaults: layers = [1, 20, 1].
    d_in, d_hidden, d_out = 1, 20, 1
    n = 300  # not a multiple of 128 -> exercises the lane-padding path

    key = jax.random.PRNGKey(0)
    k_x, k_w1, k_b1, k_w2, k_b2 = jax.random.split(key, 5)

    x = jax.random.uniform(
        k_x, (n, d_in), minval=0.0, maxval=2.0 * jnp.pi, dtype=jnp.float32
    )

    # PyTorch-style uniform(-1/sqrt(fan_in), 1/sqrt(fan_in)) init.
    bound1 = 1.0 / jnp.sqrt(d_in)
    w1 = jax.random.uniform(k_w1, (d_in, d_hidden), minval=-bound1, maxval=bound1,
                            dtype=jnp.float32)
    b1 = jax.random.uniform(k_b1, (1, d_hidden), minval=-bound1, maxval=bound1,
                            dtype=jnp.float32)
    bound2 = 1.0 / jnp.sqrt(d_hidden)
    w2 = jax.random.uniform(k_w2, (d_hidden, d_out), minval=-bound2, maxval=bound2,
                            dtype=jnp.float32)
    b2 = jax.random.uniform(k_b2, (1, d_out), minval=-bound2, maxval=bound2,
                            dtype=jnp.float32)

    out = jax.block_until_ready(net_forward(x, w1, b1, w2, b2))

    ref = reference_forward(x, w1, b1, w2, b2)
    assert out.shape == (n, d_out)
    err = float(jnp.max(jnp.abs(out - ref)))
    # Exact tanh-based sigmoid -> tight tolerance.
    assert jnp.allclose(out, ref, atol=1e-5, rtol=1e-5), err

    print("KERNEL_OK")
</pallas_src>

<mosaic_0001>
module attributes {stable_mosaic.version = 11 : i64} {
  func.func @mlp_kernel(%arg0: memref<1x384xf32, #tpu.memory_space<vmem>>, %arg1: memref<20x3xf32, #tpu.memory_space<vmem>>, %arg2: memref<1x1xf32, #tpu.memory_space<smem>>, %arg3: memref<1x384xf32, #tpu.memory_space<vmem>>) attributes {dimension_semantics = [], scalar_prefetch = 0 : i64, scratch_operands = 0 : i64, tpu.core_type = #tpu.core_type<tc>} {
    %c0 = arith.constant 0 : index
    %c0_0 = arith.constant 0 : index
    %0 = vector.load %arg0[%c0, %c0_0] : memref<1x384xf32, #tpu.memory_space<vmem>>, vector<1x384xf32>
    %c0_1 = arith.constant 0 : index
    %c0_2 = arith.constant 0 : index
    %1 = vector.load %arg1[%c0_1, %c0_2] : memref<20x3xf32, #tpu.memory_space<vmem>>, vector<20x1xf32>
    %c0_3 = arith.constant 0 : index
    %c1 = arith.constant 1 : index
    %2 = vector.load %arg1[%c0_3, %c1] : memref<20x3xf32, #tpu.memory_space<vmem>>, vector<20x1xf32>
    %c0_4 = arith.constant 0 : index
    %c2 = arith.constant 2 : index
    %3 = vector.load %arg1[%c0_4, %c2] : memref<20x3xf32, #tpu.memory_space<vmem>>, vector<20x1xf32>
    %4 = vector.broadcast %1 : vector<20x1xf32> to vector<20x384xf32>
    %5 = vector.broadcast %0 : vector<1x384xf32> to vector<20x384xf32>
    %6 = arith.mulf %4, %5 : vector<20x384xf32>
    %7 = vector.broadcast %2 : vector<20x1xf32> to vector<20x384xf32>
    %8 = arith.addf %6, %7 : vector<20x384xf32>
    %cst = arith.constant 5.000000e-01 : f32
    %9 = vector.broadcast %cst : f32 to vector<20x384xf32>
    %10 = arith.mulf %9, %8 : vector<20x384xf32>
    %11 = math.tanh %10 : vector<20x384xf32>
    %cst_5 = arith.constant 5.000000e-01 : f32
    %12 = vector.broadcast %cst_5 : f32 to vector<20x384xf32>
    %13 = arith.mulf %12, %11 : vector<20x384xf32>
    %cst_6 = arith.constant 5.000000e-01 : f32
    %14 = vector.broadcast %cst_6 : f32 to vector<20x384xf32>
    %15 = arith.addf %13, %14 : vector<20x384xf32>
    %16 = vector.broadcast %3 : vector<20x1xf32> to vector<20x384xf32>
    %17 = arith.mulf %16, %15 : vector<20x384xf32>
    %cst_7 = arith.constant dense<0.000000e+00> : vector<384xf32>
    %18 = vector.multi_reduction <add>, %17, %cst_7 [0] : vector<20x384xf32> to vector<384xf32>
    %19 = vector.shape_cast %18 : vector<384xf32> to vector<1x384xf32>
    %c0_8 = arith.constant 0 : index
    %c0_9 = arith.constant 0 : index
    %20 = memref.load %arg2[%c0_8, %c0_9] : memref<1x1xf32, #tpu.memory_space<smem>>
    %21 = vector.broadcast %20 : f32 to vector<1x384xf32>
    %22 = arith.addf %19, %21 : vector<1x384xf32>
    %c0_10 = arith.constant 0 : index
    %c0_11 = arith.constant 0 : index
    %23 = vector.load %arg3[%c0_10, %c0_11] : memref<1x384xf32, #tpu.memory_space<vmem>>, vector<1x384xf32>
    tpu.vector_store %arg3[%c0_10, %c0_11], %22 {strides = array<i32>} : memref<1x384xf32, #tpu.memory_space<vmem>>, vector<1x384xf32>,
    return
  }
}

</mosaic_0001>

<bundles_post_ra>
// kernel: tpu_custom_call.1
= control target key start
LH: loop header
LB: loop body
LE: loop exit
PB: predicated region body
PF: predicated region fallthrough
CT: control target
= control target key end

     0   :  { %v270_v2 = vmov 0   ;;  %s333_s0 = inlined_call_operand.vmem [shape: f32[1,384], index: 0, kind: input, shape index: {}]   ;;  %s334_s1 = inlined_call_operand.vmem [shape: f32[20,3], index: 1, kind: input, shape index: {}]   ;;  %s335_s2 = inlined_call_operand.<no memory space> [shape: f32[1,1], index: 2, kind: input, shape index: {}]   ;;  %s336_s3 = inlined_call_operand.hbm [shape: f32[1,384], index: 3, kind: output, shape index: {}]  }
   0x1   :  { %v19_v0 = vld [vmem:[%s334_s1 + $0x10] sm:$0xf]  ;;  %v17_v1 = vld [vmem:[%s334_s1] sm:$0xff]  ;;  %223 = vset.pattern.permute.xlu1 %v270_v2  ;;  %222 = vset.pattern.permute.xlu0 %v270_v2 }
   0x2   :  { %9 = vsyncpa [#allocation4], 0  ;;  %32 = vperm.xlu1 %223, %v19_v0   ;;  %22 = vperm.xlu0 %222, %v17_v1   ;;  %v18_v3 = vld [vmem:[%s334_s1 + $0x8] sm:$0xff]  ;;  %v271_v4 = vmov 1   ;;  %v272_v5 = vmov 2   ;;  %v36_v6 = vlaneseq  ;;  %vm139_vm0 = vcmask 1043456  }
   0x3   :  { %v16_v11 = vld [vmem:[%s333_s0] sm:$0x7]  ;;  %s274_s20 = smov [#allocation3]  }
   0x4   :  { %v305_v7 = vshrl.u32 %v36_v6, 7  ;;  %s209_s21 = sshll.u32 %s274_s20, 4  ;;  %vm200_vm1 = vcmp.lt.s32.totalorder %v36_v6, 384  ;;  %s210_s21 = int_to_ptr.vmem [resolvable:$true] %s209_s21 }
   0x5   :  { %s250_s22 = scalar_lea.vmem %s210_s21, 64  ;;  %p251_p1 = scmp.lt.s32.totalorder %s210_s21, %s210_s21 }
   0x6   :  { %224 = vset.pattern.permute.xlu1 %v271_v4  ;;  %27 = vperm.xlu0 %222, %v18_v3   ;;  %v38_v8 = vsub.s32 0, %v305_v7  ;;  %v42_v9 = vsub.s32 1, %v305_v7  ;;  %v46_v10 = vsub.s32 2, %v305_v7 }
   0x7   :  { %61 = vperm.xlu1 %224, %v17_v1  }
   0x8   :  { %v39_v13 = vrot.slane %v16_v11, %v38_v8  ;;  %v43_v14 = vrot.slane %v16_v11, %v42_v9  ;;  %v47_v15 = vrot.slane %v16_v11, %v46_v10 }
   0xa   :  { %225 = vset.pattern.permute.xlu0 %v271_v4 }
   0xb   :  { %69 = vperm.xlu1 %224, %v19_v0   ;;  %65 = vperm.xlu0 %225, %v18_v3  }
   0xf   :  { %226 = vset.pattern.permute.xlu1 %v272_v5  ;;  %227 = vset.pattern.permute.xlu0 %v272_v5 }
  0x10   :  { %118 = vperm.xlu1 %226, %v17_v1   ;;  %122 = vperm.xlu0 %227, %v18_v3  }
  0x14   :  { %126 = vperm.xlu1 %226, %v19_v0  }
  0x81   :  { %v23_v12 = vpop.permute.xlu0 %22  ;;  %v33_v16 = vpop.permute.xlu1 %32 }
  0x82   :  { %v51_v17 = vmul.f32 %v39_v13, %v23_v12  ;;  %v52_v18 = vmul.f32 %v43_v14, %v23_v12  ;;  %v53_v19 = vmul.f32 %v47_v15, %v23_v12  ;;  %v57_v25 = vmul.f32 %v39_v13, %v33_v16 }
  0x83   :  { %v58_v26 = vmul.f32 %v43_v14, %v33_v16  ;;  %v59_v27 = vmul.f32 %v47_v15, %v33_v16 }
  0x85   :  { %v28_v20 = vpop.permute.xlu0 %27 }
  0x86   :  { %v62_v21 = vpop.permute.xlu1 %61  ;;  %v54_v30 = vmul.f32 %v39_v13, %v28_v20  ;;  %v55_v31 = vmul.f32 %v43_v14, %v28_v20  ;;  %v56_v32 = vmul.f32 %v47_v15, %v28_v20 }
  0x87   :  { %v72_v22 = vadd.f32 %v62_v21, %v51_v17  ;;  %v73_v23 = vadd.f32 %v62_v21, %v52_v18  ;;  %v74_v24 = vadd.f32 %v62_v21, %v53_v19 }
  0x89   :  { %v81_v28 = vmul.f32 0.5, %v72_v22  ;;  %v82_v29 = vmul.f32 0.5, %v73_v23  ;;  %v83_v33 = vmul.f32 0.5, %v74_v24 }
  0x8a   :  { %v70_v34 = vpop.permute.xlu1 %69  ;;  %v66_v35 = vpop.permute.xlu0 %65 }
  0x8b   :  { %v78_v36 = vadd.f32 %v70_v34, %v57_v25  ;;  %v79_v37 = vadd.f32 %v70_v34, %v58_v26  ;;  %v80_v38 = vadd.f32 %v70_v34, %v59_v27  ;;  %228 = vtanh.f32 %v81_v28 }
  0x8c   :  { %v75_v39 = vadd.f32 %v66_v35, %v54_v30  ;;  %v76_v40 = vadd.f32 %v66_v35, %v55_v31  ;;  %v77_v41 = vadd.f32 %v66_v35, %v56_v32  ;;  %230 = vtanh.f32 %v82_v29 }
  0x8d   :  { %v87_v42 = vmul.f32 0.5, %v78_v36  ;;  %v88_v43 = vmul.f32 0.5, %v79_v37  ;;  %v89_v44 = vmul.f32 0.5, %v80_v38  ;;  %232 = vtanh.f32 %v83_v33 }
  0x8e   :  { %v84_v45 = vmul.f32 0.5, %v75_v39  ;;  %v85_v46 = vmul.f32 0.5, %v76_v40  ;;  %v86_v47 = vmul.f32 0.5, %v77_v41 }
  0x8f   :  { %234 = vtanh.f32 %v87_v42  ;;  %v119_v50 = vpop.permute.xlu1 %118  ;;  %v123_v10 = vpop.permute.xlu0 %122  ;;  %v273_v42 = vmov 1966171168  }
  0x90   :  { %236 = vtanh.f32 %v88_v43  ;;  %v176_v43 = vunpack.c.l.s4 %v273_v42 }
  0x91   :  { %238 = vtanh.f32 %v89_v44 }
  0x92   :  { %240 = vtanh.f32 %v84_v45 }
  0x93   :  { %242 = vtanh.f32 %v85_v46  ;;  %v127_v1 = vpop.permute.xlu1 %126 }
  0x94   :  { %244 = vtanh.f32 %v86_v47 }
  0x95   :  { %v229_v48 = vpop.eup %228 }
  0x96   :  { %v231_v49 = vpop.eup %230  ;;  %v99_v53 = vmul.f32 0.5, %v229_v48 }
  0x97   :  { %v233_v51 = vpop.eup %232  ;;  %v100_v55 = vmul.f32 0.5, %v231_v49 }
  0x98   :  { %v101_v58 = vmul.f32 0.5, %v233_v51  ;;  %v108_v0 = vadd.f32 0.5, %v99_v53  ;;  %v177_v51 = vunpack.c.0.s8 %v176_v43 }
  0x99   :  { %v235_v52 = vpop.eup %234  ;;  %v109_v5 = vadd.f32 0.5, %v100_v55 }
  0x9a   :  { %v237_v54 = vpop.eup %236  ;;  %v105_v56 = vmul.f32 0.5, %v235_v52  ;;  %v110_v12 = vadd.f32 0.5, %v101_v58  ;;  %v129_v18 = vmul.f32 %v119_v50, %v108_v0  ;;  %v180_v58 = vsub.s32 %v177_v51, %v305_v7 }
  0x9b   :  { %v239_v57 = vpop.eup %238  ;;  %v106_v59 = vmul.f32 0.5, %v237_v54  ;;  %v130_v21 = vmul.f32 %v119_v50, %v109_v5 }
  0x9c   :  { %v241_v60 = vpop.eup %240  ;;  %v107_v61 = vmul.f32 0.5, %v239_v57  ;;  %v114_v62 = vadd.f32 0.5, %v105_v56  ;;  %v131_v24 = vmul.f32 %v119_v50, %v110_v12  ;;  %v167_v50 = vstv %s335_s2  ;;  %s246_s2 = scalar_lea.vmem %s210_s21, 48 }
  0x9d   :  { %v243_v63 = vpop.eup %242  ;;  %v115_v2 = vadd.f32 0.5, %v106_v59  ;;  %v102_v3 = vmul.f32 0.5, %v241_v60  ;;  %p247_p0 = scmp.ne.s32.totalorder %s210_s21, %s246_s2  ;;  %p252_p2 = scmp.lt.s32.totalorder %s250_s22, %s246_s2 }
  0x9e   :  { %v245_v4 = vpop.eup %244  ;;  %v116_v8 = vadd.f32 0.5, %v107_v61  ;;  %v135_v9 = vmul.f32 %v127_v1, %v114_v62  ;;  %v103_v11 = vmul.f32 0.5, %v243_v63 }
  0x9f   :  { %v136_v13 = vmul.f32 %v127_v1, %v115_v2  ;;  %v104_v14 = vmul.f32 0.5, %v245_v4  ;;  %v111_v15 = vadd.f32 0.5, %v102_v3  ;;  %p253_p3 = por %p252_p2, %p251_p1 }
  0xa0   :  { %v137_v16 = vmul.f32 %v127_v1, %v116_v8  ;;  %v112_v17 = vadd.f32 0.5, %v103_v11  ;;  %v140_v22 = vsel %vm139_vm0, %v135_v9, 0.0 }
  0xa1   :  { %v113_v19 = vadd.f32 0.5, %v104_v14  ;;  %v132_v20 = vmul.f32 %v123_v10, %v111_v15  ;;  %v149_v25 = vsel %vm139_vm0, %v136_v13, 0.0  ;;  %p254_p4 = pnand %p253_p3, %p247_p0 }
  0xa2   :  { %v133_v23 = vmul.f32 %v123_v10, %v112_v17  ;;  %v158_v28 = vsel %vm139_vm0, %v137_v16, 0.0 }
  0xa3   :  { %v134_v26 = vmul.f32 %v123_v10, %v113_v19  ;;  %v138_v27 = vadd.f32 %v132_v20, %v129_v18 }
  0xa4   :  { %v148_v29 = vadd.f32 %v133_v23, %v130_v21 }
  0xa5   :  { %v141_v30 = vadd.f32 %v140_v22, %v138_v27  ;;  %v157_v31 = vadd.f32 %v134_v26, %v131_v24 }
  0xa6   :  { %v150_v32 = vadd.f32 %v149_v25, %v148_v29 }
  0xa7   :  { %v142_v33 = vrot.slane %v141_v30, 4  ;;  %v159_v34 = vadd.f32 %v158_v28, %v157_v31 }
  0xa8   :  { %v151_v35 = vrot.slane %v150_v32, 4 }
  0xa9   :  { %v143_v36 = vadd.f32 %v142_v33, %v141_v30  ;;  %v160_v37 = vrot.slane %v159_v34, 4 }
  0xaa   :  { %v152_v38 = vadd.f32 %v151_v35, %v150_v32 }
  0xab   :  { %v144_v39 = vrot.slane %v143_v36, 2  ;;  %v161_v40 = vadd.f32 %v160_v37, %v159_v34 }
  0xac   :  { %v153_v41 = vrot.slane %v152_v38, 2 }
  0xad   :  { %v145_v44 = vadd.f32 %v144_v39, %v143_v36  ;;  %v162_v45 = vrot.slane %v161_v40, 2 }
  0xae   :  { %v154_v46 = vadd.f32 %v153_v41, %v152_v38 }
  0xaf   :  { %v146_v47 = vrot.slane %v145_v44, 1  ;;  %v163_v48 = vadd.f32 %v162_v45, %v161_v40 }
  0xb0   :  { %v155_v49 = vrot.slane %v154_v46, 1 }
  0xb1   :  { %v147_v52 = vadd.f32 %v146_v47, %v145_v44  ;;  %v164_v53 = vrot.slane %v163_v48, 1 }
  0xb2   :  { %v156_v54 = vadd.f32 %v155_v49, %v154_v46 }
  0xb3   :  { %v165_v55 = vadd.f32 %v164_v53, %v163_v48  ;;  %v168_v56 = vadd.f32 %v167_v50, %v147_v52 }
  0xb4   :  { %v169_v57 = vadd.f32 %v167_v50, %v156_v54 }
  0xb5   :  { %v170_v59 = vadd.f32 %v167_v50, %v165_v55 }
  0xb6   :  { %v174_v60 = vcombine.low %v168_v56, %v169_v57 }
  0xb7   :  { %v188_v62 = vrot.slane %v170_v59, %v180_v58 }
  0xb8   :  { %v181_v61 = vrot.slane %v174_v60, %v180_v58 }
  0xba   :  { %v189_v63 = vcombine.low %v181_v61, %v188_v62 }
  0xbc   :  { %v196_v0 = vrot.slane %v189_v63, %v180_v58 }
  0xbe   :  { %202 = vst.msk [vmem:[#allocation3] sm:$0x7] %vm200_vm1, %v196_v0 }
  0xbf   :  { %257 = shalt.err (!%p254_p4)
}
  0xc0   :  { %s258_s25 = scalar_lea.hbm %s336_s3, 48 }
  0xc1   :  { %p259_p5 = scmp.ne.s32.totalorder %s336_s3, %s258_s25  ;;  %p262_p6 = scmp.lt.u32.totalorder %s258_s25, %s336_s3 }
  0xc3   :  { %p264_p7 = pnand %p262_p6, %p259_p5 }
  0xc5   :  { %267 = shalt.err (!%p264_p7)
}
  0xc6   :  { %212 = dma.vmem_to_hbm [thread:$0]  %s210_s21, 48, %s336_s3, [#allocation4]  }
  0xc7   :  { %268 = dma.done.wait [#allocation4], 48  }
  0xc8   :  { %269 = vsyncadd [#allocation4], 4294967248 }
  0xc9   :  { %216 = vsyncpa [#allocation4], 1 }

</bundles_post_ra>
